<compile_context>
chip_gen: v6e
topology: v6e:2x2x1
jax: 0.10.0
libtpu: 0.0.40
codegen_flags: <defaults>
</compile_context>

<pallas_src>
import functools

import jax
import jax.numpy as jnp
from jax.experimental import pallas as pl
from jax.experimental.pallas import tpu as pltpu


def cnf_kernel(x_ref, t_ref, w1x_ref, w1t_ref, b1_ref, w2_ref, b2_ref,
               w3_ref, b3_ref, o_ref):
    """One batch tile: 3 MXU matmuls (bf16 operands, f32 acc), 2 EUP tanh,
    bias adds / rank-1 time update / residual on the VPU in f32."""
    x = x_ref[...]                                    # (TB, dim)  f32
    t = t_ref[...]                                    # (TB, 1)    f32

    # Layer 1: split matmul + rank-1 time update (replaces cat([x, t], -1)).
    h1 = jnp.dot(x.astype(jnp.bfloat16), w1x_ref[...],
                 preferred_element_type=jnp.float32)
    h1 = jnp.tanh(h1 + t * w1t_ref[...] + b1_ref[...])

    # Layer 2.
    h2 = jnp.dot(h1.astype(jnp.bfloat16), w2_ref[...],
                 preferred_element_type=jnp.float32)
    h2 = jnp.tanh(h2 + b2_ref[...])

    # Layer 3 + residual.
    y = jnp.dot(h2.astype(jnp.bfloat16), w3_ref[...],
                preferred_element_type=jnp.float32) + b3_ref[...]
    o_ref[...] = x + y


def _pick_batch_tile(batch, max_tile=1024):
    """Largest batch tile that (a) divides batch, (b) is a multiple of 8
    (sublane constraint), (c) is <= max_tile.  Falls back to the full batch
    (full-array blocks are exempt from the (8,128) divisibility rule)."""
    if batch <= max_tile:
        return batch
    tile = max_tile - (max_tile % 8)
    while tile >= 8:
        if batch % tile == 0:
            return tile
        tile -= 8
    return batch


@functools.partial(jax.jit, static_argnames=("block_b",))
def cnf_layer(x, t, params, *, block_b=1024):
    """x: (B, dim) f32, t: (B,) f32 -> (B, dim) f32 (== x + MLP(cat(x, t)))."""
    w1, b1, w2, b2, w3, b3 = params
    B, dim = x.shape
    hidden = w1.shape[1]

    # Layout plumbing (runs under jit, outside the kernel):
    #   * split W1 into the x-part (MXU matmul) and the t-row (VPU rank-1 add),
    #   * pre-cast matmul weights to bf16 (halves resident VMEM / HBM traffic),
    #   * biases as (1, H) / (1, dim) f32 rows for lane-broadcast adds.
    w1x = w1[:dim].astype(jnp.bfloat16)               # (dim, H)
    w1t = w1[dim:dim + 1].astype(jnp.float32)         # (1, H)  stays f32 (VPU)
    b1r = jnp.reshape(b1, (1, hidden)).astype(jnp.float32)
    w2b = w2.astype(jnp.bfloat16)                     # (H, H)
    b2r = jnp.reshape(b2, (1, hidden)).astype(jnp.float32)
    w3b = w3.astype(jnp.bfloat16)                     # (H, dim)
    b3r = jnp.reshape(b3, (1, dim)).astype(jnp.float32)
    t2 = jnp.reshape(t, (B, 1)).astype(x.dtype)       # (B, 1)

    tb = _pick_batch_tile(B, block_b)
    grid = (B // tb,)

    # x and out share the identical tile window (residual read/write aliasing
    # at the BlockSpec level; buffer-level input_output_aliases intentionally
    # skipped so callers may keep reusing x after the call).
    row_spec = pl.BlockSpec((tb, dim), lambda i: (i, 0))   # x / out tiles
    t_spec = pl.BlockSpec((tb, 1), lambda i: (i, 0))

    def resident(shape):          # weights / biases: same block every step
        return pl.BlockSpec(shape, lambda i: (0, 0))

    return pl.pallas_call(
        cnf_kernel,
        out_shape=jax.ShapeDtypeStruct((B, dim), x.dtype),
        grid=grid,
        in_specs=[
            row_spec,                       # x      (streamed)
            t_spec,                         # t      (streamed)
            resident((dim, hidden)),        # w1x    (bf16, resident)
            resident((1, hidden)),          # w1t    (f32,  resident)
            resident((1, hidden)),          # b1
            resident((hidden, hidden)),     # w2     (bf16, resident)
            resident((1, hidden)),          # b2
            resident((hidden, dim)),        # w3     (bf16, resident)
            resident((1, dim)),             # b3
        ],
        out_specs=row_spec,
        compiler_params=pltpu.CompilerParams(
            dimension_semantics=("parallel",),
            vmem_limit_bytes=32 * 1024 * 1024),
    )(x, t2, w1x, w1t, b1r, w2b, b2r, w3b, b3r)


def init_params(key, dim, hidden_dim):
    """Deterministic synthetic init (nn.Linear weights stored transposed so
    the kernel does x @ W)."""
    k1, k2, k3, k4, k5, k6 = jax.random.split(key, 6)
    w1 = jax.random.normal(k1, (dim + 1, hidden_dim), jnp.float32) * 0.1
    b1 = jax.random.normal(k2, (1, hidden_dim), jnp.float32) * 0.1
    w2 = jax.random.normal(k3, (hidden_dim, hidden_dim), jnp.float32) * 0.1
    b2 = jax.random.normal(k4, (1, hidden_dim), jnp.float32) * 0.1
    w3 = jax.random.normal(k5, (hidden_dim, dim), jnp.float32) * 0.1
    b3 = jax.random.normal(k6, (1, dim), jnp.float32) * 0.1
    return (w1, b1, w2, b2, w3, b3)


def cnf_layer_ref(x, t, params):
    """Pure-JAX f32 reference (mirrors the PyTorch forward exactly)."""
    w1, b1, w2, b2, w3, b3 = params
    xt = jnp.concatenate([x, t[:, None]], axis=-1)
    h1 = jnp.tanh(xt @ w1 + b1)
    h2 = jnp.tanh(h1 @ w2 + b2)
    return x + (h2 @ w3 + b3)


if __name__ == "__main__":
    B, dim, hidden_dim = 8, 4, 32

    key = jax.random.PRNGKey(0)
    kx, kt, kp = jax.random.split(key, 3)
    x = jax.random.normal(kx, (B, dim), jnp.float32)
    t = jax.random.normal(kt, (B,), jnp.float32)
    params = init_params(kp, dim, hidden_dim)

    out = jax.block_until_ready(cnf_layer(x, t, params))
    ref = cnf_layer_ref(x, t, params)

    assert out.shape == (B, dim)
    # bf16 MXU operands with f32 accumulation -> tolerance loosened vs pure f32.
    assert jnp.allclose(out, ref, atol=1e-2, rtol=1e-2), "mismatch vs reference"

    print("KERNEL_OK")
</pallas_src>

<mosaic_0001>
module attributes {stable_mosaic.version = 11 : i64} {
  func.func @cnf_kernel(%arg0: i32, %arg1: memref<8x4xf32, #tpu.memory_space<vmem>>, %arg2: memref<8x1xf32, #tpu.memory_space<vmem>>, %arg3: memref<4x32xbf16, #tpu.memory_space<vmem>>, %arg4: memref<1x32xf32, #tpu.memory_space<vmem>>, %arg5: memref<1x32xf32, #tpu.memory_space<vmem>>, %arg6: memref<32x32xbf16, #tpu.memory_space<vmem>>, %arg7: memref<1x32xf32, #tpu.memory_space<vmem>>, %arg8: memref<32x4xbf16, #tpu.memory_space<vmem>>, %arg9: memref<1x4xf32, #tpu.memory_space<vmem>>, %arg10: memref<8x4xf32, #tpu.memory_space<vmem>>) attributes {dimension_semantics = [#tpu.dimension_semantics<parallel>], iteration_bounds = array<i64: 1>, scalar_prefetch = 0 : i64, scratch_operands = 0 : i64, tpu.core_type = #tpu.core_type<tc>, window_params = [{transform_indices = @transform_0, window_bounds = array<i64: 8, 4>}, {transform_indices = @transform_1, window_bounds = array<i64: 8, 1>}, {pipeline_mode = #tpu.pipeline_mode<synchronous>, transform_indices = @transform_2, window_bounds = array<i64: 4, 32>}, {pipeline_mode = #tpu.pipeline_mode<synchronous>, transform_indices = @transform_3, window_bounds = array<i64: 1, 32>}, {pipeline_mode = #tpu.pipeline_mode<synchronous>, transform_indices = @transform_4, window_bounds = array<i64: 1, 32>}, {pipeline_mode = #tpu.pipeline_mode<synchronous>, transform_indices = @transform_5, window_bounds = array<i64: 32, 32>}, {pipeline_mode = #tpu.pipeline_mode<synchronous>, transform_indices = @transform_6, window_bounds = array<i64: 1, 32>}, {pipeline_mode = #tpu.pipeline_mode<synchronous>, transform_indices = @transform_7, window_bounds = array<i64: 32, 4>}, {pipeline_mode = #tpu.pipeline_mode<synchronous>, transform_indices = @transform_8, window_bounds = array<i64: 1, 4>}, {transform_indices = @transform_9, window_bounds = array<i64: 8, 4>}]} {
    %c0 = arith.constant 0 : index
    %c0_0 = arith.constant 0 : index
    %0 = vector.load %arg1[%c0, %c0_0] : memref<8x4xf32, #tpu.memory_space<vmem>>, vector<8x4xf32>
    %c0_1 = arith.constant 0 : index
    %c0_2 = arith.constant 0 : index
    %1 = vector.load %arg2[%c0_1, %c0_2] : memref<8x1xf32, #tpu.memory_space<vmem>>, vector<8x1xf32>
    %2 = arith.truncf %0 : vector<8x4xf32> to vector<8x4xbf16>
    %c0_3 = arith.constant 0 : index
    %c0_4 = arith.constant 0 : index
    %3 = vector.load %arg3[%c0_3, %c0_4] : memref<4x32xbf16, #tpu.memory_space<vmem>>, vector<4x32xbf16>
    %cst = arith.constant dense<0.000000e+00> : vector<8x32xf32>
    %4 = tpu.matmul %2, %3, %cst {dimension_numbers = #tpu.dot_dimension_numbers<[1], [0], [0], [1], [0, 0, 1, 1], [], []>} : vector<8x4xbf16>, vector<4x32xbf16>, vector<8x32xf32> -> vector<8x32xf32>
    %c0_5 = arith.constant 0 : index
    %c0_6 = arith.constant 0 : index
    %5 = vector.load %arg4[%c0_5, %c0_6] : memref<1x32xf32, #tpu.memory_space<vmem>>, vector<1x32xf32>
    %6 = vector.broadcast %1 : vector<8x1xf32> to vector<8x32xf32>
    %7 = vector.broadcast %5 : vector<1x32xf32> to vector<8x32xf32>
    %8 = arith.mulf %6, %7 : vector<8x32xf32>
    %9 = arith.addf %4, %8 : vector<8x32xf32>
    %c0_7 = arith.constant 0 : index
    %c0_8 = arith.constant 0 : index
    %10 = vector.load %arg5[%c0_7, %c0_8] : memref<1x32xf32, #tpu.memory_space<vmem>>, vector<1x32xf32>
    %11 = vector.broadcast %10 : vector<1x32xf32> to vector<8x32xf32>
    %12 = arith.addf %9, %11 : vector<8x32xf32>
    %13 = math.tanh %12 : vector<8x32xf32>
    %14 = arith.truncf %13 : vector<8x32xf32> to vector<8x32xbf16>
    %c0_9 = arith.constant 0 : index
    %c0_10 = arith.constant 0 : index
    %15 = vector.load %arg6[%c0_9, %c0_10] : memref<32x32xbf16, #tpu.memory_space<vmem>>, vector<32x32xbf16>
    %cst_11 = arith.constant dense<0.000000e+00> : vector<8x32xf32>
    %16 = tpu.matmul %14, %15, %cst_11 {dimension_numbers = #tpu.dot_dimension_numbers<[1], [0], [0], [1], [0, 0, 1, 1], [], []>} : vector<8x32xbf16>, vector<32x32xbf16>, vector<8x32xf32> -> vector<8x32xf32>
    %c0_12 = arith.constant 0 : index
    %c0_13 = arith.constant 0 : index
    %17 = vector.load %arg7[%c0_12, %c0_13] : memref<1x32xf32, #tpu.memory_space<vmem>>, vector<1x32xf32>
    %18 = vector.broadcast %17 : vector<1x32xf32> to vector<8x32xf32>
    %19 = arith.addf %16, %18 : vector<8x32xf32>
    %20 = math.tanh %19 : vector<8x32xf32>
    %21 = arith.truncf %20 : vector<8x32xf32> to vector<8x32xbf16>
    %c0_14 = arith.constant 0 : index
    %c0_15 = arith.constant 0 : index
    %22 = vector.load %arg8[%c0_14, %c0_15] : memref<32x4xbf16, #tpu.memory_space<vmem>>, vector<32x4xbf16>
    %cst_16 = arith.constant dense<0.000000e+00> : vector<8x4xf32>
    %23 = tpu.matmul %21, %22, %cst_16 {dimension_numbers = #tpu.dot_dimension_numbers<[1], [0], [0], [1], [0, 0, 1, 1], [], []>} : vector<8x32xbf16>, vector<32x4xbf16>, vector<8x4xf32> -> vector<8x4xf32>
    %c0_17 = arith.constant 0 : index
    %c0_18 = arith.constant 0 : index
    %24 = vector.load %arg9[%c0_17, %c0_18] : memref<1x4xf32, #tpu.memory_space<vmem>>, vector<1x4xf32>
    %25 = vector.broadcast %24 : vector<1x4xf32> to vector<8x4xf32>
    %26 = arith.addf %23, %25 : vector<8x4xf32>
    %27 = arith.addf %0, %26 : vector<8x4xf32>
    %c0_19 = arith.constant 0 : index
    %c0_20 = arith.constant 0 : index
    %28 = vector.load %arg10[%c0_19, %c0_20] : memref<8x4xf32, #tpu.memory_space<vmem>>, vector<8x4xf32>
    tpu.vector_store %arg10[%c0_19, %c0_20], %27 {strides = array<i32>} : memref<8x4xf32, #tpu.memory_space<vmem>>, vector<8x4xf32>,
    return
  }
  func.func @transform_0(%arg0: i32) -> (i32, i32) {
    %c0_i32 = arith.constant 0 : i32
    %c0_i32_0 = arith.constant 0 : i32
    return %arg0, %c0_i32 : i32, i32
  }
  func.func @transform_1(%arg0: i32) -> (i32, i32) {
    %c0_i32 = arith.constant 0 : i32
    %c0_i32_0 = arith.constant 0 : i32
    return %arg0, %c0_i32 : i32, i32
  }
  func.func @transform_2(%arg0: i32) -> (i32, i32) {
    %c0_i32 = arith.constant 0 : i32
    %c0_i32_0 = arith.constant 0 : i32
    %c0_i32_1 = arith.constant 0 : i32
    return %c0_i32, %c0_i32_0 : i32, i32
  }
  func.func @transform_3(%arg0: i32) -> (i32, i32) {
    %c0_i32 = arith.constant 0 : i32
    %c0_i32_0 = arith.constant 0 : i32
    %c0_i32_1 = arith.constant 0 : i32
    return %c0_i32, %c0_i32_0 : i32, i32
  }
  func.func @transform_4(%arg0: i32) -> (i32, i32) {
    %c0_i32 = arith.constant 0 : i32
    %c0_i32_0 = arith.constant 0 : i32
    %c0_i32_1 = arith.constant 0 : i32
    return %c0_i32, %c0_i32_0 : i32, i32
  }
  func.func @transform_5(%arg0: i32) -> (i32, i32) {
    %c0_i32 = arith.constant 0 : i32
    %c0_i32_0 = arith.constant 0 : i32
    %c0_i32_1 = arith.constant 0 : i32
    return %c0_i32, %c0_i32_0 : i32, i32
  }
  func.func @transform_6(%arg0: i32) -> (i32, i32) {
    %c0_i32 = arith.constant 0 : i32
    %c0_i32_0 = arith.constant 0 : i32
    %c0_i32_1 = arith.constant 0 : i32
    return %c0_i32, %c0_i32_0 : i32, i32
  }
  func.func @transform_7(%arg0: i32) -> (i32, i32) {
    %c0_i32 = arith.constant 0 : i32
    %c0_i32_0 = arith.constant 0 : i32
    %c0_i32_1 = arith.constant 0 : i32
    return %c0_i32, %c0_i32_0 : i32, i32
  }
  func.func @transform_8(%arg0: i32) -> (i32, i32) {
    %c0_i32 = arith.constant 0 : i32
    %c0_i32_0 = arith.constant 0 : i32
    %c0_i32_1 = arith.constant 0 : i32
    return %c0_i32, %c0_i32_0 : i32, i32
  }
  func.func @transform_9(%arg0: i32) -> (i32, i32) {
    %c0_i32 = arith.constant 0 : i32
    %c0_i32_0 = arith.constant 0 : i32
    return %arg0, %c0_i32 : i32, i32
  }
}

</mosaic_0001>

<bundles_post_ra>
// kernel: cnf_layer.1
= control target key start
LH: loop header
LB: loop body
LE: loop exit
PB: predicated region body
PF: predicated region fallthrough
CT: control target
= control target key end

     0   :  { %vm54_vm0 = vcmask 1041408   ;;  %v302_v0 = vmov 0.0   ;;  %vm303_vm1 = vmmov 0   ;;  %v304_v6 = vmov 0   ;;  %s395_s2 = inlined_call_operand.vmem [shape: bf16[4,32], index: 2, kind: input, shape index: {}]   ;;  %s396_s0 = inlined_call_operand.vmem [shape: f32[8,4], index: 0, kind: input, shape index: {}]   ;;  %s397_s1 = inlined_call_operand.vmem [shape: f32[8,1], index: 1, kind: input, shape index: {}]   ;;  %s398_s5 = inlined_call_operand.vmem [shape: bf16[32,32], index: 5, kind: input, shape index: {}]   ;;  %s399_s3 = inlined_call_operand.vmem [shape: f32[1,32], index: 3, kind: input, shape index: {}]   ;;  %s400_s4 = inlined_call_operand.vmem [shape: f32[1,32], index: 4, kind: input, shape index: {}]   ;;  %s401_s7 = inlined_call_operand.vmem [shape: bf16[32,4], index: 7, kind: input, shape index: {}]   ;;  %s402_s6 = inlined_call_operand.vmem [shape: f32[1,32], index: 6, kind: input, shape index: {}]   ;;  %s403_s8 = inlined_call_operand.vmem [shape: f32[1,4], index: 8, kind: input, shape index: {}]   ;;  %s404_s9 = inlined_call_operand.vmem [shape: f32[8,4], index: 9, kind: output, shape index: {}]  }
   0x1   :  { %268 = vmatprep.subr.bf16.mxu0 %v302_v0  ;;  %v36_v1 = vld [vmem:[%s395_s2] sm:$0x3]  ;;  %270 = vmatprep.mubr.msk.bf16.mxu0 %vm303_vm1, %v302_v0  ;;  %vm50_vm2 = vcmask 31744   ;;  %v294_v7 = vld [vmem:[%s398_s5 + $0x8] sm:$0xff]   ;;  %vm131_vm3 = vcmask 261120  }
   0x2   :  { %v33_v2 = vld [vmem:[%s396_s0] sm:$0xff]  ;;  %v56_v4 = vsel %vm54_vm0, %v36_v1, 0  ;;  %293 = vset.pattern.permute.xlu0 %v304_v6  ;;  %274 = vmatprep.subr.bf16.mxu1 %v302_v0  ;;  %v296_v21 = vld [vmem:[%s401_s7 + $0x8] sm:$0xff]  }
   0x3   :  { %v34_v3 = vld [vmem:[%s397_s1] sm:$0xff]  ;;  %v35_v5 = vpack.c.bf16 %v33_v2, %v33_v2  ;;  %269 = vmatpush3.bf16.msra.mxu0 %v56_v4  ;;  %278 = vmatprep.mubr.msk.bf16.mxu1 %vm303_vm1, %v302_v0 }
   0x4   :  { %40 = vperm.xlu0 %293, %v34_v3   ;;  %282 = vmatprep.subr.bf16.mxu0 %v302_v0  ;;  %v295_v8 = vld [vmem:[%s398_s5] sm:$0xff]  }
   0x5   :  { %275 = vmatpush3.bf16.msra.mxu1 %v294_v7  ;;  %v249_v9 = vld [vmem:[%s399_s3] ss:$0 sm:$0xff] }
   0x6   :  { %271 = vmatmul.mubr.msk.bf16.vlgmr.msra.gmra.mxu0 %vm50_vm2, %v35_v5  ;;  %276 = vmatprep.subr.bf16.mxu1 %v302_v0  ;;  %v251_v13 = vld [vmem:[%s400_s4] ss:$0 sm:$0xff] }
   0x7   :  { %286 = vmatprep.mubr.msk.bf16.mxu0 %vm303_vm1, %v302_v0  ;;  %283 = vmatpush3.bf16.msra.mxu0 %v296_v21  ;;  %v297_v22 = vld [vmem:[%s401_s7] sm:$0xff]  }
   0x8   :  { %284 = vmatprep.subr.bf16.mxu0 %v302_v0  ;;  %v252_v23 = vld [vmem:[%s402_s6] ss:$0 sm:$0xff] }
   0x9   :  { %277 = vmatpush3.bf16.msra.mxu1 %v295_v8  ;;  %v256_v31 = vld [vmem:[%s403_s8] ss:$0 sm:$0xff] }
   0xb   :  { %285 = vmatpush3.bf16.msra.mxu0 %v297_v22 }
  0x7f   :  { %v41_v10 = vpop.permute.xlu0 %40 }
  0x80   :  { %v49_v11 = vmul.f32 %v249_v9, %v41_v10 }
  0xc6   :  { %v92_v12 = vpop.f32.mrf.mxu0 }
  0xc7   :  { %v93_v14 = vadd.f32 %v92_v12, %v49_v11 }
  0xc8   :  { %v272_v15 = vpop.f32.mrf.mxu0 }
  0xc9   :  { %v105_v16 = vadd.f32 %v251_v13, %v93_v14 }
  0xca   :  { %v95_v17 = vpop.f32.mrf.mxu0 }
  0xcb   :  { %298 = vtanh.f32 %v105_v16 }
  0xcc   :  { %v273_v18 = vpop.f32.mrf.mxu0 }
  0xd8   :  { %v299_v19 = vpop.eup %298 }
  0xd9   :  { %v107_v20 = vpack.c.bf16 %v299_v19, %v299_v19 }
  0xdb   :  { %279 = vmatmul.mubr.msk.bf16.vlgmr.msra.gmra.mxu1 %vm131_vm3, %v107_v20 }
 0x19b   :  { %v169_v24 = vpop.f32.mrf.mxu1 }
 0x19c   :  { %v170_v25 = vadd.f32 %v252_v23, %v169_v24 }
 0x19d   :  { %v280_v26 = vpop.f32.mrf.mxu1 }
 0x19e   :  { %300 = vtanh.f32 %v170_v25 }
 0x19f   :  { %v172_v27 = vpop.f32.mrf.mxu1 }
 0x1a1   :  { %v281_v28 = vpop.f32.mrf.mxu1 }
 0x1ab   :  { %v301_v29 = vpop.eup %300 }
 0x1ac   :  { %v176_v30 = vpack.c.bf16 %v301_v29, %v301_v29 }
 0x1ae   :  { %287 = vmatmul.mubr.msk.bf16.vlgmr.msra.gmra.mxu0 %vm131_vm3, %v176_v30 }
 0x26e   :  { %v237_v32 = vpop.f32.mrf.mxu0 }
 0x26f   :  { %v238_v33 = vadd.f32 %v256_v31, %v237_v32 }
 0x270   :  { %v288_v34 = vpop.f32.mrf.mxu0 }
 0x271   :  { %v243_v35 = vadd.f32 %v238_v33, %v33_v2 }
 0x272   :  { %v240_v36 = vpop.f32.mrf.mxu0 }
 0x273   :  { %244 = vst.msk [vmem:[%s404_s9] sm:$0xff] %vm50_vm2, %v243_v35 }
 0x274   :  { %v289_v37 = vpop.f32.mrf.mxu0 }

</bundles_post_ra>
